<compile_context>
chip_gen: v7x
topology: tpu7x:2x2x1
jax: 0.10.0
libtpu: 0.0.40
codegen_flags: <defaults>
</compile_context>

<pallas_src>
import jax
import jax.numpy as jnp
from jax.experimental import pallas as pl
from jax.experimental.pallas import tpu as pltpu


def _round_up(x, m):
    return ((x + m - 1) // m) * m


def _mlp_kernel(x_ref, w1_ref, b1_ref, w2_ref, b2_ref, o_ref, h_ref):
    # grid = (batch tiles, E tiles). h is computed once per batch tile (at E-tile
    # index 0) and cached in VMEM scratch (bf16) for the remaining E tiles.
    @pl.when(pl.program_id(1) == 0)
    def _():
        x = x_ref[...].astype(jnp.bfloat16)                     # in-kernel cast (f32 -> bf16)
        h = jnp.dot(x, w1_ref[...], preferred_element_type=jnp.float32)
        h_ref[...] = jnp.maximum(h + b1_ref[...], 0.0).astype(jnp.bfloat16)

    y = jnp.dot(h_ref[...], w2_ref[...], preferred_element_type=jnp.float32)
    o_ref[...] = (y + b2_ref[...]).astype(o_ref.dtype)


def prepare_params(w1, b1, w2, b2):
    """Pad/cast the MLP parameters ONCE (hoisted out of the per-call forward path).

    Layout is (in_features, out_features), i.e. the transpose of PyTorch's nn.Linear
    weight layout, so the kernel computes x @ W + b directly.
    """
    C, H = w1.shape
    E = w2.shape[1]
    Ep = _round_up(E, 128)                                       # lane-dense output stores

    w1p = jnp.asarray(w1, jnp.bfloat16)
    b1p = jnp.asarray(b1, jnp.float32).reshape(1, H)
    w2b = jnp.asarray(w2, jnp.bfloat16)
    b2f = jnp.asarray(b2, jnp.float32).reshape(1, E)
    if Ep != E:
        w2p = jnp.zeros((H, Ep), jnp.bfloat16).at[:, :E].set(w2b)
        b2p = jnp.zeros((1, Ep), jnp.float32).at[:, :E].set(b2f)
    else:
        w2p, b2p = w2b, b2f

    return {"w1": w1p, "b1": b1p, "w2": w2p, "b2": b2p,
            "C": C, "H": H, "E": E, "Ep": Ep}


def _vmem_cap_bytes():
    """Generation-aware usable-VMEM cap (leave headroom for compiler-internal scratch)."""
    cap = 64 << 20
    try:
        cap = int(pltpu.get_tpu_info().vmem_capacity_bytes)
    except Exception:
        pass
    # v7x (64 MiB physical) -> ~56 MiB usable; v5e/v6e (128 MiB) -> ~112 MiB usable.
    return cap - max(8 << 20, cap // 8)


def _footprint_bytes(tb, te, C, H, Ep, wbuf):
    """Accurate per-(8,128)-rounded VMEM footprint estimate for one kernel config."""
    lane = lambda n: _round_up(n, 128)
    sub = lambda n: _round_up(n, 8)
    ne = Ep // te
    w2buf = wbuf if ne == 1 else 2            # w2/b2 blocks change with j when E-tiled
    b = 0
    b += 2 * sub(tb) * lane(C) * 4            # x tiles (f32, double-buffered)
    b += wbuf * sub(C) * lane(H) * 2          # w1 (bf16, resident)
    b += wbuf * 8 * lane(H) * 4               # b1 (f32, (8,128)-rounded block)
    b += w2buf * sub(H) * lane(te) * 2        # w2 tile (bf16)
    b += w2buf * 8 * lane(te) * 4             # b2 tile (f32)
    b += 2 * sub(tb) * lane(te) * 4           # output tiles (f32, double-buffered)
    b += sub(tb) * lane(H) * 2                # h scratch (bf16)
    b += sub(tb) * (lane(H) * 4 + lane(te) * 4 + lane(C) * 2)   # live intermediates
    return b


def content_mapping_forward(content, params, *, batch_tile=None, out_dtype=jnp.float32):
    """content: (B, C) float32; params: output of prepare_params(). Returns (B, E)."""
    B, C = content.shape
    assert C == params["C"], "content feature dim does not match fc1 weight"
    H, E, Ep = params["H"], params["E"], params["Ep"]
    w1p, b1p, w2p, b2p = params["w1"], params["b1"], params["w2"], params["b2"]

    single_buffer = hasattr(pl, "Buffered")    # static capability check, no runtime fallback
    wbuf = 1 if single_buffer else 2
    cap = _vmem_cap_bytes()

    # ---- E tiling: keep both weights resident when they fit; otherwise tile w2 columns. ----
    n128 = Ep // 128
    te_cands = sorted({128 * d for d in range(1, n128 + 1) if n128 % d == 0}, reverse=True)
    te = te_cands[-1]
    tb_probe = min(256, _round_up(B, 8))
    for cand in te_cands:
        if _footprint_bytes(tb_probe, cand, C, H, Ep, wbuf) <= cap:
            te = cand
            break
    # TODO(synk): if w1 alone (C*H bf16) cannot fit VMEM even at te=128, a K-tiled
    # two-pass path would be needed; not implemented here.

    # ---- Batch tile: large tiles amortize per-step overhead; small-B uses round_up(B, 8). ----
    tb_max = _round_up(B, 8)
    if batch_tile is not None:
        tb = max(8, min(_round_up(batch_tile, 8), tb_max))
    else:
        cands = [t for t in (512, 256, 128) if t <= tb_max] or [tb_max]
        tb = cands[-1]
        for cand in cands:
            if _footprint_bytes(cand, te, C, H, Ep, wbuf) <= cap:
                tb = cand
                break

    Bp = _round_up(B, tb)
    ne = Ep // te
    grid = (Bp // tb, ne)

    # Pad the batch only when needed (no wrapper-side cast of x; cast happens in-kernel).
    xp = content if Bp == B else jnp.zeros((Bp, C), content.dtype).at[:B].set(content)

    def weight_spec(shape, index_map, constant):
        if single_buffer and constant:
            return pl.BlockSpec(shape, index_map, pipeline_mode=pl.Buffered(1))
        return pl.BlockSpec(shape, index_map)

    in_specs = [
        pl.BlockSpec((tb, C), lambda i, j: (i, 0)),               # x tile (double-buffered)
        weight_spec((C, H), lambda i, j: (0, 0), True),           # w1 (resident)
        weight_spec((1, H), lambda i, j: (0, 0), True),           # b1 (resident)
        weight_spec((H, te), lambda i, j: (0, j), ne == 1),       # w2 tile
        weight_spec((1, te), lambda i, j: (0, j), ne == 1),       # b2 tile
    ]
    out_specs = pl.BlockSpec((tb, te), lambda i, j: (i, j))

    needed = _footprint_bytes(tb, te, C, H, Ep, wbuf)
    vmem_limit = int(min(cap, max(needed + (4 << 20), 32 << 20)))

    yp = pl.pallas_call(
        _mlp_kernel,
        out_shape=jax.ShapeDtypeStruct((Bp, Ep), out_dtype),
        grid_spec=pltpu.PrefetchScalarGridSpec(
            num_scalar_prefetch=0,
            grid=grid,
            in_specs=in_specs,
            out_specs=out_specs,
            scratch_shapes=[pltpu.VMEM((tb, H), jnp.bfloat16)],   # cached relu(fc1(x)) tile
        ),
        compiler_params=pltpu.CompilerParams(
            dimension_semantics=("parallel", "arbitrary"),
            vmem_limit_bytes=vmem_limit,
        ),
    )(xp, w1p, b1p, w2p, b2p)

    if Bp != B or Ep != E:
        return yp[:B, :E]
    return yp


def init_params(key, content_dim, hidden_dim, item_embedding_dim):
    """Deterministic init mimicking PyTorch nn.Linear default (U[-1/sqrt(fan_in), +1/sqrt(fan_in)])."""
    k1, k2, k3, k4 = jax.random.split(key, 4)
    lim1 = 1.0 / jnp.sqrt(content_dim)
    lim2 = 1.0 / jnp.sqrt(hidden_dim)
    # stored as (in, out): transpose of PyTorch's (out, in) weight layout
    w1 = jax.random.uniform(k1, (content_dim, hidden_dim), jnp.float32, -lim1, lim1)
    b1 = jax.random.uniform(k2, (1, hidden_dim), jnp.float32, -lim1, lim1)
    w2 = jax.random.uniform(k3, (hidden_dim, item_embedding_dim), jnp.float32, -lim2, lim2)
    b2 = jax.random.uniform(k4, (1, item_embedding_dim), jnp.float32, -lim2, lim2)
    return w1, b1, w2, b2


if __name__ == "__main__":
    # Small shapes consistent with the module's forward: content (B, content_dim)
    B, CONTENT_DIM, HIDDEN_DIM, ITEM_EMB_DIM = 32, 32, 64, 16

    key = jax.random.PRNGKey(0)
    k_x, k_p = jax.random.split(key)
    content = jax.random.normal(k_x, (B, CONTENT_DIM), jnp.float32)
    w1, b1, w2, b2 = init_params(k_p, CONTENT_DIM, HIDDEN_DIM, ITEM_EMB_DIM)

    # Pad/cast the weights once (hoisted out of the per-call path).
    params = prepare_params(w1, b1, w2, b2)

    # batch_tile=16 -> 2-step "parallel" grid (exercises pipelining and both v7x cores);
    # production-sized batches use the 512/256/128 auto-selected tile instead.
    out = content_mapping_forward(content, params, batch_tile=16)
    out = jax.block_until_ready(out)

    # Reference check in plain JAX (same math as the PyTorch forward), f32 throughout.
    ref = jnp.maximum(content @ w1 + b1, 0.0) @ w2 + b2
    assert out.shape == (B, ITEM_EMB_DIM)
    max_err = float(jnp.max(jnp.abs(out - ref)))
    # bf16 MXU inputs with f32 accumulation -> tolerance loosened vs. the pure-f32 reference.
    assert max_err < 5e-2, f"mismatch vs reference, max abs err = {max_err}"

    print("KERNEL_OK")
</pallas_src>

<mosaic_0001>
module attributes {stable_mosaic.version = 11 : i64} {
  func.func @_mlp_kernel(%arg0: i32, %arg1: i32, %arg2: memref<16x32xf32, #tpu.memory_space<vmem>>, %arg3: memref<32x64xbf16, #tpu.memory_space<vmem>>, %arg4: memref<1x64xf32, #tpu.memory_space<vmem>>, %arg5: memref<64x128xbf16, #tpu.memory_space<vmem>>, %arg6: memref<1x128xf32, #tpu.memory_space<vmem>>, %arg7: memref<16x128xf32, #tpu.memory_space<vmem>>, %arg8: memref<16x64xbf16, #tpu.memory_space<vmem>>) attributes {dimension_semantics = [#tpu.dimension_semantics<parallel>, #tpu.dimension_semantics<arbitrary>], iteration_bounds = array<i64: 2, 1>, scalar_prefetch = 0 : i64, scratch_operands = 1 : i64, tpu.core_type = #tpu.core_type<tc>, window_params = [{transform_indices = @transform_0, window_bounds = array<i64: 16, 32>}, {pipeline_mode = #tpu.pipeline_mode<synchronous>, transform_indices = @transform_1, window_bounds = array<i64: 32, 64>}, {pipeline_mode = #tpu.pipeline_mode<synchronous>, transform_indices = @transform_2, window_bounds = array<i64: 1, 64>}, {pipeline_mode = #tpu.pipeline_mode<synchronous>, transform_indices = @transform_3, window_bounds = array<i64: 64, 128>}, {pipeline_mode = #tpu.pipeline_mode<synchronous>, transform_indices = @transform_4, window_bounds = array<i64: 1, 128>}, {transform_indices = @transform_5, window_bounds = array<i64: 16, 128>}]} {
    %c0_i32 = arith.constant 0 : i32
    %0 = arith.cmpi eq, %arg1, %c0_i32 : i32
    %1 = arith.extui %0 : i1 to i32
    %c0_i32_0 = arith.constant 0 : i32
    %2 = arith.cmpi ne, %1, %c0_i32_0 : i32
    scf.if %2 {
      %c0_8 = arith.constant 0 : index
      %c0_9 = arith.constant 0 : index
      %10 = vector.load %arg2[%c0_8, %c0_9] : memref<16x32xf32, #tpu.memory_space<vmem>>, vector<16x32xf32>
      %11 = arith.truncf %10 : vector<16x32xf32> to vector<16x32xbf16>
      %c0_10 = arith.constant 0 : index
      %c0_11 = arith.constant 0 : index
      %12 = vector.load %arg3[%c0_10, %c0_11] : memref<32x64xbf16, #tpu.memory_space<vmem>>, vector<32x64xbf16>
      %cst_12 = arith.constant dense<0.000000e+00> : vector<16x64xf32>
      %13 = tpu.matmul %11, %12, %cst_12 {dimension_numbers = #tpu.dot_dimension_numbers<[1], [0], [0], [1], [0, 0, 1, 1], [], []>} : vector<16x32xbf16>, vector<32x64xbf16>, vector<16x64xf32> -> vector<16x64xf32>
      %c0_13 = arith.constant 0 : index
      %c0_14 = arith.constant 0 : index
      %14 = vector.load %arg4[%c0_13, %c0_14] : memref<1x64xf32, #tpu.memory_space<vmem>>, vector<1x64xf32>
      %15 = vector.broadcast %14 : vector<1x64xf32> to vector<16x64xf32>
      %16 = arith.addf %13, %15 : vector<16x64xf32>
      %cst_15 = arith.constant 0.000000e+00 : f32
      %17 = vector.broadcast %cst_15 : f32 to vector<16x64xf32>
      %18 = arith.maximumf %16, %17 : vector<16x64xf32>
      %19 = arith.truncf %18 : vector<16x64xf32> to vector<16x64xbf16>
      %c0_16 = arith.constant 0 : index
      %c0_17 = arith.constant 0 : index
      %20 = vector.load %arg8[%c0_16, %c0_17] : memref<16x64xbf16, #tpu.memory_space<vmem>>, vector<16x64xbf16>
      tpu.vector_store %arg8[%c0_16, %c0_17], %19 {strides = array<i32>} : memref<16x64xbf16, #tpu.memory_space<vmem>>, vector<16x64xbf16>,
    } else {
    }
    %c0 = arith.constant 0 : index
    %c0_1 = arith.constant 0 : index
    %3 = vector.load %arg8[%c0, %c0_1] : memref<16x64xbf16, #tpu.memory_space<vmem>>, vector<16x64xbf16>
    %c0_2 = arith.constant 0 : index
    %c0_3 = arith.constant 0 : index
    %4 = vector.load %arg5[%c0_2, %c0_3] : memref<64x128xbf16, #tpu.memory_space<vmem>>, vector<64x128xbf16>
    %cst = arith.constant dense<0.000000e+00> : vector<16x128xf32>
    %5 = tpu.matmul %3, %4, %cst {dimension_numbers = #tpu.dot_dimension_numbers<[1], [0], [0], [1], [0, 0, 1, 1], [], []>} : vector<16x64xbf16>, vector<64x128xbf16>, vector<16x128xf32> -> vector<16x128xf32>
    %c0_4 = arith.constant 0 : index
    %c0_5 = arith.constant 0 : index
    %6 = vector.load %arg6[%c0_4, %c0_5] : memref<1x128xf32, #tpu.memory_space<vmem>>, vector<1x128xf32>
    %7 = vector.broadcast %6 : vector<1x128xf32> to vector<16x128xf32>
    %8 = arith.addf %5, %7 : vector<16x128xf32>
    %c0_6 = arith.constant 0 : index
    %c0_7 = arith.constant 0 : index
    %9 = vector.load %arg7[%c0_6, %c0_7] : memref<16x128xf32, #tpu.memory_space<vmem>>, vector<16x128xf32>
    tpu.vector_store %arg7[%c0_6, %c0_7], %8 {strides = array<i32>} : memref<16x128xf32, #tpu.memory_space<vmem>>, vector<16x128xf32>,
    return
  }
  func.func @transform_0(%arg0: i32, %arg1: i32) -> (i32, i32) {
    %c0_i32 = arith.constant 0 : i32
    %c0_i32_0 = arith.constant 0 : i32
    return %arg0, %c0_i32 : i32, i32
  }
  func.func @transform_1(%arg0: i32, %arg1: i32) -> (i32, i32) {
    %c0_i32 = arith.constant 0 : i32
    %c0_i32_0 = arith.constant 0 : i32
    %c0_i32_1 = arith.constant 0 : i32
    return %c0_i32, %c0_i32_0 : i32, i32
  }
  func.func @transform_2(%arg0: i32, %arg1: i32) -> (i32, i32) {
    %c0_i32 = arith.constant 0 : i32
    %c0_i32_0 = arith.constant 0 : i32
    %c0_i32_1 = arith.constant 0 : i32
    return %c0_i32, %c0_i32_0 : i32, i32
  }
  func.func @transform_3(%arg0: i32, %arg1: i32) -> (i32, i32) {
    %c0_i32 = arith.constant 0 : i32
    %c0_i32_0 = arith.constant 0 : i32
    return %c0_i32, %arg1 : i32, i32
  }
  func.func @transform_4(%arg0: i32, %arg1: i32) -> (i32, i32) {
    %c0_i32 = arith.constant 0 : i32
    %c0_i32_0 = arith.constant 0 : i32
    return %c0_i32, %arg1 : i32, i32
  }
  func.func @transform_5(%arg0: i32, %arg1: i32) -> (i32, i32) {
    %c0_i32 = arith.constant 0 : i32
    return %arg0, %arg1 : i32, i32
  }
}

</mosaic_0001>

<bundles_post_ra>
// kernel: tpu_custom_call.1
= control target key start
LH: loop header
LB: loop body
LE: loop exit
PB: predicated region body
PF: predicated region fallthrough
CT: control target
= control target key end

     0   :  { %10 = vsyncpa [#allocation4], 0  ;;  %s1246_s0 = inlined_call_operand.hbm [shape: f32[32,32], index: 0, kind: input, shape index: {}]   ;;  %s1247_s1 = inlined_call_operand.hbm [shape: bf16[32,64], index: 1, kind: input, shape index: {}]   ;;  %s1248_s2 = inlined_call_operand.vmem [shape: f32[1,64], index: 2, kind: input, shape index: {}]   ;;  %s1249_s3 = inlined_call_operand.hbm [shape: bf16[64,128], index: 3, kind: input, shape index: {}]   ;;  %s1250_s4 = inlined_call_operand.vmem [shape: f32[1,128], index: 4, kind: input, shape index: {}]   ;;  %s1251_s5 = inlined_call_operand.hbm [shape: f32[32,128], index: 5, kind: output, shape index: {}]  }
   0x1   :  { %12 = vsyncpa [#allocation4 + $0x1], 0 }
   0x2   :  { %13 = vsyncpa [#allocation7], 0 }
   0x3   :  { %14 = vsyncpa [#allocation5], 0 }
   0x4   :  { %16 = vsyncpa [#allocation5 + $0x1], 0  ;;  %s981_s18 = smov 0   ;;  %s983_s19 = smov 0  }
   0x5   :  { %s985_s20 = smov 0   ;;  %s987_s21 = smov 0  }
   0x6   :  { %s989_s22 = smov 0   ;;  %s991_s23 = smov 0  }
   0x7 LB: > { %s608_s24 = sadd.s32 4294967295, %s937_s23   ;;  %s609_s25 = sadd.s32 4294967294, %s937_s23   ;;  %s937_s23 = sphi %s991_s23, %s22_s23   ;;  %s933_s22 = sphi %s989_s22, %s1273_s22   ;;  %s929_s21 = sphi %s987_s21, %s1272_s21   ;;  %s925_s20 = sphi %s985_s20, %s1271_s20   ;;  %s921_s19 = sphi %s983_s19, %s1270_s19   ;;  %s917_s18 = sphi %s981_s18, %s1269_s18  }
   0x8   : > { %p54_p0 = scmp.ne.s32.totalorder %s921_s19, %s917_s18  ;;  %p1015_p1 = scmp.eq.s32.totalorder %s608_s24, 0 }
   0x9   : > { %p1019_p2 = scmp.eq.s32.totalorder %s608_s24, 1  ;;  %p180_p3 = scmp.eq.s32.totalorder %s609_s25, 1 }
   0xa   : > { %s1256_s26 = scalar_select %p1015_p1, 1, 0 }
   0xb   : > { %p1025_p4 = por %p1015_p1, %p54_p0  ;;  %p610_p5 = scmp.ge.s32.totalorder %s937_s23, 1 }
   0xc   : > { %p1030_p6 = por %p180_p3, %p54_p0  ;;  %p187_p7 = scmp.lt.s32.totalorder %s937_s23, 3 }
   0xd   : > { %s1258_s28 = scalar_select %p1025_p4, 1, 0 }
   0xe   : > { %s1259_s29 = scalar_select %p1030_p6, 1, 0 }
   0xf   : > { %p1035_p8 = pnand %p610_p5, %p187_p7  ;;  %s939_s6 = smov [#allocation6]  }
  0x10   : > { %s199_s7 = sshll.u32 %s939_s6, 4  ;;  %s940_s9 = smov [#allocation8]   ;;  %s1039_s7 = int_to_ptr.vmem [resolvable:$true] %s199_s7 }
  0x11   : > { %p680_p9 = pneg %p1035_p8  ;;  %s217_s10 = sshll.u32 %s940_s9, 4  ;;  %s1050_s10 = int_to_ptr.vmem [resolvable:$true] %s217_s10 }
  0x12   : > { %s765_s13 = scalar_lea.hbm %s1247_s1, 256 }
  0x13   : > { %p1046_p11 = pnand %p680_p9, %p1015_p1  ;;  %p766_p12 = scmp.ne.s32.totalorder %s1247_s1, %s765_s13 }
  0x14   : > { %p772_p5 = scmp.lt.u32.totalorder %s765_s13, %s1247_s1 }
  0x15   : > { %p767_p13 = pneg %p1046_p11 }
  0x17   : > { %p768_p0 = pnand %p767_p13, %p766_p12 }
  0x19   : > { %p769_p3 = pneg %p768_p0 }
  0x1b   : > { %p774_p7 = pnand %p772_p5, %p769_p3 }
  0x1d   : > { %777 = shalt.err (!%p774_p7)
}
  0x1e   : > { %s778_s24 = scalar_lea.vmem %s1039_s7, 256  ;;  %p786_p1 = scmp.lt.s32.totalorder %s1039_s7, %s1039_s7 }
  0x1f   : > { %p779_p9 = scmp.ne.s32.totalorder %s1039_s7, %s778_s24  ;;  %p787_p12 = scmp.lt.s32.totalorder %s778_s24, %s778_s24 }
  0x21   : > { %p781_p10 = pnand %p779_p9, %p767_p13  ;;  %p788_p0 = por %p787_p12, %p786_p1 }
  0x23   : > { %p782_p6 = pneg %p781_p10 }
  0x25   : > { %p789_p4 = pnand %p788_p0, %p782_p6 }
  0x27   : > { %792 = shalt.err (!%p789_p4)
}
  0x28   : > { %s941_s25 = smov 64   ;;  %s942_s6 = smov 4  }
  0x29   : > { %683 = dma.hbm_to_vmem [thread:$0]  (!%p1046_p11), %s1247_s1, 256, %s1039_s7, [#allocation7], %s941_s25, %s941_s25, %s942_s6  }
  0x2a   : > { %s793_s14 = scalar_lea.hbm %s1249_s3, 512 }
  0x2b   : > { %p794_p1 = scmp.ne.s32.totalorder %s1249_s3, %s793_s14  ;;  %p800_p10 = scmp.lt.u32.totalorder %s793_s14, %s1249_s3 }
  0x2d   : > { %p796_p4 = pnand %p794_p1, %p767_p13 }
  0x2f   : > { %p797_p6 = pneg %p796_p4 }
  0x31   : > { %p802_p3 = pnand %p800_p10, %p797_p6 }
  0x33   : > { %805 = shalt.err (!%p802_p3)
}
  0x34   : > { %s806_s7 = scalar_lea.vmem %s1050_s10, 512  ;;  %p814_p12 = scmp.lt.s32.totalorder %s1050_s10, %s1050_s10 }
  0x35   : > { %p807_p5 = scmp.ne.s32.totalorder %s1050_s10, %s806_s7  ;;  %p815_p0 = scmp.lt.s32.totalorder %s806_s7, %s806_s7 }
  0x37   : > { %p809_p7 = pnand %p807_p5, %p767_p13  ;;  %p816_p1 = por %p815_p0, %p814_p12 }
  0x39   : > { %p810_p9 = pneg %p809_p7 }
  0x3b   : > { %p817_p4 = pnand %p816_p1, %p810_p9 }
  0x3d   : > { %820 = shalt.err (!%p817_p4)
}
  0x3e   : > { %686 = dma.hbm_to_vmem [thread:$0]  (!%p1046_p11), %s1249_s3, 512, %s1050_s10, [#allocation7], %s941_s25, %s941_s25, %s942_s6  }
  0x3f   : > { %s34_s12 = sadd.s32 1, %s933_s22  ;;  %s41_s13 = sadd.s32 1, %s925_s20 }
  0x40   : > { %p36_p13 = scmp.ge.s32.totalorder %s34_s12, 2  ;;  %p48_p6 = scmp.ne.s32.totalorder %s925_s20, %s921_s19 }
  0x41   : > { %p49_p10 = scmp.eq.s32.totalorder %s937_s23, 0  ;;  %p697_p3 = scmp.lt.s32.totalorder %s937_s23, 2 }
  0x42   : > { %s1275_s12 = smov (%p36_p13, %s34_s12), 0  ;;  %p1114_p7 = por %p1019_p2, %p48_p6 }
  0x43   : > { %p50_p5 = por %p49_p10, %p48_p6  ;;  %s38_s14 = ssub.s32 %s933_s22, %s1275_s12 }
  0x44   : > { %s1262_s8 = scalar_select %p1114_p7, 1, 0 }
  0x45   : > { %s237_s15 = sand.u32 1, %s925_s20   ;;  %p39_p9 = scmp.eq.s32.totalorder %s38_s14, 0 }
  0x46   : > { %s615_s10 = sshll.u32 %s237_s15, 4  ;;  %s638_s25 = sshll.u32 %s933_s22, 8 }
  0x47   : > { %s1123_s6 = scalar_select %p39_p9, %s925_s20, %s41_s13  }
  0x48   : > { %s1128_s24 = scalar_lea.hbm %s1246_s0, %s638_s25  ;;  %s241_s27 = scalar_lea.vmem [#allocation3], %s615_s10 }
  0x49   : > { %s248_s7 = sshll.u32 %s241_s27, 4  ;;  %p1132_p2 = pnand %p697_p3, %p50_p5  ;;  %s1136_s7 = int_to_ptr.vmem [resolvable:$true] %s248_s7 }
  0x4a   : > { %s1138_s11 = scalar_lea.sflag [#allocation4], %s237_s15  ;;  %s821_s13 = scalar_lea.hbm %s1128_s24, 256 }
  0x4b   : > { %p822_p11 = scmp.ne.s32.totalorder %s1128_s24, %s821_s13  ;;  %p823_p12 = pneg %p1132_p2 }
  0x4c   : > { %s826_s25 = scalar_lea.hbm %s1246_s0, 512  ;;  %p827_p4 = scmp.lt.u32.totalorder %s1128_s24, %s1246_s0 }
  0x4d   : > { %p824_p0 = pnand %p823_p12, %p822_p11  ;;  %p828_p13 = scmp.lt.u32.totalorder %s826_s25, %s821_s13 }
  0x4e   : > { %p830_p10 = scmp.lt.u32.totalorder %s821_s13, %s1128_s24 }
  0x4f   : > { %p825_p1 = pneg %p824_p0  ;;  %p829_p6 = por %p828_p13, %p827_p4 }
  0x51   : > { %p831_p3 = por %p830_p10, %p829_p6 }
  0x53   : > { %p832_p5 = pnand %p831_p3, %p825_p1 }
  0x55   : > { %835 = shalt.err (!%p832_p5)
}
  0x56   : > { %s836_s15 = scalar_lea.vmem %s1136_s7, 256  ;;  %s943_s27 = smov [#allocation3]  }
  0x57   : > { %p837_p9 = scmp.ne.s32.totalorder %s1136_s7, %s836_s15  ;;  %s841_s14 = sshll.u32 %s943_s27, 4  ;;  %s842_s14 = int_to_ptr.vmem [resolvable:$false] %s841_s14 }
  0x58   : > { %s843_s10 = scalar_lea.vmem %s842_s14, 512  ;;  %p844_p7 = scmp.lt.s32.totalorder %s1136_s7, %s842_s14 }
  0x59   : > { %p839_p11 = pnand %p837_p9, %p823_p12  ;;  %p845_p4 = scmp.lt.s32.totalorder %s843_s10, %s836_s15 }
  0x5b   : > { %p840_p0 = pneg %p839_p11  ;;  %p846_p13 = por %p845_p4, %p844_p7 }
  0x5d   : > { %p847_p6 = pnand %p846_p13, %p840_p0 }
  0x5f   : > { %850 = shalt.err (!%p847_p6)
}
  0x60   : > { %s944_s13 = smov 128   ;;  %s945_s25 = smov 8  }
  0x61   : > { %690 = dma.hbm_to_vmem [thread:$0]  (!%p1132_p2), %s1128_s24, 256, %s1136_s7, %s1138_s11, %s944_s13, %s944_s13, %s945_s25  }
  0x62   : > { %260 = sbr.rel (%p1035_p8) target bundleno = 578 (0x242), region = 40  ;;  %s1169_s16 = sand.u32 (!%p1035_p8), 1, %s921_s19  }
  0x63   : > { %s619_s17 = sshll.u32 (!%p1035_p8), %s1169_s16, 4  ;;  %s263_s15 = scalar_lea.sflag (!%p1035_p8), [#allocation4], %s1169_s16 }
  0x64   : > { %s266_s27 = scalar_lea.vmem (!%p1035_p8), [#allocation3], %s619_s17  ;;  %p1264_p7 = scmp.ne.s32.totalorder (!%p1035_p8), %s1258_s28, 0 }
  0x69   : > { %904 = dma.done.wait (%p1264_p7), %s263_s15, 256  }
  0x6a   : > { %906 = vsyncadd (%p1264_p7), %s263_s15, 4294967040  ;;  %p1265_p2 = scmp.ne.s32.totalorder %s1256_s26, 0 }
  0x6c   : > { %908 = dma.done.wait (%p1265_p2), [#allocation7], 768  }
  0x6d   : > { %910 = vsyncadd (%p1265_p2), [#allocation7], 4294966528  ;;  %v946_v0 = vmov 0.0   ;;  %vm947_vm0 = vmmov 0   ;;  %v759_v1 = vld [vmem:[#allocation6] sm:$0xff]   ;;  %v760_v2 = vld [vmem:[#allocation6 + $0x8] sm:$0xff]  }
  0x6e   : > { %648 = vmatprep.subr.bf16.mxu0 %v946_v0  ;;  %652 = vmatprep.mubr.msk.bf16.mxu0 %vm947_vm0, %v946_v0  ;;  %v314_v3 = vld [vmem:[%s266_s27] sm:$0xff]  ;;  %v315_v4 = vld [vmem:[%s266_s27 + $0x8] sm:$0xff]  ;;  %vm340_vm1 = vcmask 261120   ;;  %vm388_vm2 = vcmask 523264   ;;  %s303_s7 = scalar_lea.vmem [#allocation9], %s619_s17  ;;  %s639_s11 = sshll.u32 %s929_s21, 8 }
  0x6f   : > { %656 = vmatprep.subr.bf16.mxu1 %v946_v0  ;;  %664 = vmatprep.mubr.msk.bf16.mxu1 %vm947_vm0, %v946_v0  ;;  %v316_v5 = vpack.c.bf16 %v315_v4, %v314_v3  ;;  %v761_v6 = vld [vmem:[#allocation8] sm:$0xff]   ;;  %v762_v7 = vld [vmem:[#allocation8 + $0x8] sm:$0xff]   ;;  %v763_v8 = vld [vmem:[#allocation8 + $0x10] sm:$0xff]   ;;  %s492_s9 = sshll.u32 %s303_s7, 4  ;;  %s1197_s13 = scalar_lea.hbm %s1251_s5, %s639_s11  ;;  %s1192_s9 = int_to_ptr.vmem [resolvable:$true] %s492_s9 }
  0x70   : > { %649 = vmatpush3.bf16.msra.mxu0 %v759_v1  ;;  %657 = vmatpush3.bf16.msra.mxu1 %v761_v6  ;;  %v764_v9 = vld [vmem:[#allocation8 + $0x18] sm:$0xff]   ;;  %v623_v10 = vld [vmem:[%s1248_s2] ss:$0 sm:$0xff]  ;;  %s478_s25 = scalar_lea.sflag [#allocation5], %s1169_s16  ;;  %s851_s21 = scalar_lea.vmem %s1192_s9, 256 }
  0x71   : > { %650 = vmatprep.subr.bf16.mxu0 %v946_v0  ;;  %658 = vmatprep.subr.bf16.mxu1 %v946_v0  ;;  %v627_v21 = vld [vmem:[%s1250_s4] ss:$0 sm:$0xff]  ;;  %p852_p8 = scmp.ne.s32.totalorder %s1192_s9, %s851_s21  ;;  %p1266_p12 = scmp.ne.s32.totalorder %s1262_s8, 0 }
  0x72   : > { %s948_s17 = smov [#allocation9]  }
  0x73   : > { %p853_p1 = pnand %p852_p8, %p1266_p12  ;;  %s855_s15 = sshll.u32 %s948_s17, 4  ;;  %s856_s15 = int_to_ptr.vmem [resolvable:$false] %s855_s15 }
  0x74   : > { %651 = vmatpush3.bf16.msra.mxu0 %v760_v2  ;;  %659 = vmatpush3.bf16.msra.mxu1 %v762_v7  ;;  %s857_s27 = scalar_lea.vmem %s856_s15, 512  ;;  %p858_p3 = scmp.lt.s32.totalorder %s1192_s9, %s856_s15 }
  0x75   : > { %660 = vmatprep.subr.bf16.mxu1 %v946_v0  ;;  %p854_p10 = pneg %p853_p1  ;;  %p859_p5 = scmp.lt.s32.totalorder %s857_s27, %s851_s21 }
  0x77   : > { %653 = vmatmul.mubr.msk.bf16.vlgmr.msra.gmra.mrb[0].mxu0 %vm340_vm1, %v316_v5  ;;  %p860_p9 = por %p859_p5, %p858_p3 }
  0x78   : > { %661 = vmatpush3.bf16.msra.mxu1 %v763_v8 }
  0x79   : > { %662 = vmatprep.subr.bf16.mxu1 %v946_v0  ;;  %p861_p11 = pnand %p860_p9, %p854_p10 }
  0x7c   : > { %663 = vmatpush3.bf16.msra.mxu1 %v764_v9 }
 0x14a   : > { %v378_v11 = vpop.f32.mrb[0].mxu0 }
 0x14b   : > { %v379_v12 = vadd.f32 %v623_v10, %v378_v11  ;;  %v654_v13 = vpop.f32.mrb[1].mxu0 }
 0x14c   : > { %v381_v14 = vpop.f32.mrb[2].mxu0 }
 0x14d   : > { %v382_v15 = vadd.f32 %v623_v10, %v381_v14  ;;  %v655_v16 = vpop.f32.mrb[3].mxu0  ;;  %v385_v17 = vmax.f32 %v379_v12, 0.0 }
 0x14f   : > { %v386_v18 = vmax.f32 %v382_v15, 0.0 }
 0x151   : > { %v387_v19 = vpack.c.bf16 %v386_v18, %v385_v17 }
 0x153   : > { %389 = vst.msk [vmem:[#allocation2] sm:$0xff] %vm388_vm2, %v387_v19 }
 0x15a   : > { %v390_v20 = vld [vmem:[#allocation2] sm:$0xff] }
 0x15b   : > { %665 = vmatmul.mubr.msk.bf16.vlgmr.msra.gmra.mrb[0].mxu1 %vm388_vm2, %v390_v20 }
 0x22e   : > { %v468_v22 = vpop.f32.mrb[0].mxu1 }
 0x22f   : > { %v469_v23 = vadd.f32 %v627_v21, %v468_v22  ;;  %v666_v24 = vpop.f32.mrb[1].mxu1 }
 0x230   : > { %v471_v25 = vpop.f32.mrb[2].mxu1 }
 0x231   : > { %475 = vst [vmem:[%s303_s7] sm:$0xff] %v469_v23  ;;  %v472_v26 = vadd.f32 %v627_v21, %v471_v25  ;;  %v667_v27 = vpop.f32.mrb[3].mxu1 }
 0x233   : > { %476 = vst [vmem:[%s303_s7 + $0x8] sm:$0xff] %v472_v26 }
 0x234   : > { %864 = shalt.err (!%p861_p11)
}
 0x235   : > { %s865_s26 = scalar_lea.hbm %s1197_s13, 256  ;;  %s869_s24 = scalar_lea.hbm %s1251_s5, 512 }
 0x236   : > { %p866_p0 = scmp.ne.s32.totalorder %s1197_s13, %s865_s26  ;;  %p870_p6 = scmp.lt.u32.totalorder %s1197_s13, %s1251_s5 }
 0x237   : > { %p871_p7 = scmp.lt.u32.totalorder %s869_s24, %s865_s26  ;;  %p873_p8 = scmp.lt.u32.totalorder %s865_s26, %s1197_s13 }
 0x238   : > { %p867_p4 = pnand %p866_p0, %p1266_p12 }
 0x239   : > { %p872_p2 = por %p871_p7, %p870_p6 }
 0x23a   : > { %p868_p13 = pneg %p867_p4 }
 0x23b   : > { %p874_p1 = por %p873_p8, %p872_p2 }
 0x23d   : > { %p875_p10 = pnand %p874_p1, %p868_p13 }
 0x23f   : > { %878 = shalt.err (!%p875_p10)
}
 0x240   : > { %s949_s14 = smov 128   ;;  %s950_s10 = smov 8  }
 0x241   : > { %678 = dma.vmem_to_hbm [thread:$0]  (%p1266_p12), %s1192_s9, 256, %s1197_s13, %s478_s25, %s949_s14, %s949_s14, %s950_s10  }
 0x242 PF: > { %s507_s21 = sand.u32 1, %s917_s18   ;;  %p1267_p3 = scmp.ne.s32.totalorder %s1259_s29, 0 }
 0x243   : > { %p1268_p5 = scmp.ge.s32.totalorder %s937_s23, 2  ;;  %s508_s17 = scalar_lea.sflag [#allocation5], %s507_s21 }
 0x245   : > { %p692_p9 = pnand %p1268_p5, %p1267_p3 }
 0x247   : > { %912 = dma.done.wait (!%p692_p9), %s508_s17, 256  }
 0x248   : > { %914 = vsyncadd (!%p692_p9), %s508_s17, 4294967040  ;;  %s22_s23 = sadd.s32 1, %s937_s23   ;;  %s1269_s18 = smov %s921_s19 }
 0x249   : > { %p19_p11 = scmp.ge.s32.totalorder %s22_s23, 4   ;;  %s1270_s19 = smov %s925_s20 }
 0x24a   : > { %s1271_s20 = smov %s1123_s6  ;;  %s1272_s21 = smov %s933_s22 }
 0x24b   : > { %s1273_s22 = smov %s1275_s12  ;;  %21 = sbr.rel (!%p19_p11) target bundleno = 7 (0x7), region = 101 }
 0x252   :  { %513 = vsyncpa [#allocation4], 1 }
 0x253   :  { %515 = vsyncpa [#allocation4 + $0x1], 1 }
 0x254   :  { %516 = vsyncpa [#allocation7], 1 }
 0x255   :  { %517 = vsyncpa [#allocation5], 1 }
 0x256   :  { %519 = vsyncpa [#allocation5 + $0x1], 1 }

</bundles_post_ra>
